<compile_context>
chip_gen: v5e
topology: v5e:2x2
jax: 0.10.0
libtpu: 0.0.40
codegen_flags: <defaults>
</compile_context>

<pallas_src>
import jax
import jax.numpy as jnp
from jax.experimental import pallas as pl
from jax.experimental.pallas import tpu as pltpu


def _round_up(n, m):
    return ((n + m - 1) // m) * m


def _mse_mlp_kernel(x_ref, w1_ref, b1_ref, w2_ref, b2_ref, w3_ref, b3_ref, o_ref):
    # layer 1: (TM, in_dim) bf16 @ (in_dim, Hp) bf16 -> f32 acc, bias + ReLU in f32
    h1 = jnp.dot(x_ref[...], w1_ref[...], preferred_element_type=jnp.float32)
    h1 = jnp.maximum(h1 + b1_ref[...], 0.0)
    # dropout (eval mode) == identity

    # layer 2: cast activation to bf16 for the MXU, accumulate in f32
    h2 = jnp.dot(h1.astype(jnp.bfloat16), w2_ref[...],
                 preferred_element_type=jnp.float32)
    h2 = jnp.maximum(h2 + b2_ref[...], 0.0)
    # dropout (eval mode) == identity

    # layer 3 (fan_out = 1): VPU multiply + XLU lane reduction instead of an
    # N=1 MXU pass.  w3 arrives pre-reshaped as a (1, Hp) row (broadcasts).
    w3_row = w3_ref[...].astype(jnp.float32)
    out = jnp.sum(h2 * w3_row, axis=-1, keepdims=True) + b3_ref[...]
    o_ref[...] = out.astype(o_ref.dtype)


def mse_model_forward(x, params, *, tile_m=512):
    """Pallas forward pass of MSEModel. x: (B, in_dim) f32. Returns squeeze((B,1))."""
    w1, b1, w2, b2, w3, b3 = params
    B, in_dim = x.shape
    H = w1.shape[1]

    # ---- pad hidden dim to the 128-lane width (zero pads -> no effect on math)
    H_pad = _round_up(max(H, 128), 128)
    ph = H_pad - H
    if ph:
        w1p = jnp.pad(w1, ((0, 0), (0, ph)))
        b1p = jnp.pad(b1, ((0, 0), (0, ph)))
        w2p = jnp.pad(w2, ((0, ph), (0, ph)))
        b2p = jnp.pad(b2, ((0, 0), (0, ph)))
        w3p = jnp.pad(w3, ((0, ph), (0, 0)))
    else:
        w1p, b1p, w2p, b2p, w3p = w1, b1, w2, b2, w3
    b1p = b1p.astype(jnp.float32)
    b2p = b2p.astype(jnp.float32)
    w3_row = w3p.reshape(1, H_pad)
    b3p = jnp.reshape(b3, (1, 1)).astype(jnp.float32)

    # bf16 operands for the MXU (f32 accumulation happens inside the kernel);
    # also halves x's HBM->VMEM DMA bytes.
    x_bf = x.astype(jnp.bfloat16)
    w1_bf = w1p.astype(jnp.bfloat16)
    w2_bf = w2p.astype(jnp.bfloat16)
    w3_bf = w3_row.astype(jnp.bfloat16)

    # ---- batch tiling: tile TM, pad B up so every block is full-size.
    # TM is always a multiple of 8 (sublane constraint on the second-minor dim).
    tm = min(tile_m, _round_up(B, 16))
    B_pad = _round_up(B, tm)
    if B_pad != B:
        x_bf = jnp.pad(x_bf, ((0, B_pad - B), (0, 0)))
    nb = B_pad // tm

    cost = pl.CostEstimate(
        flops=2 * B_pad * (in_dim * H_pad + H_pad * H_pad + H_pad),
        transcendentals=0,
        bytes_accessed=(x_bf.size * 2 + w1_bf.size * 2 + w2_bf.size * 2
                        + w3_bf.size * 2 + b1p.size * 4 + b2p.size * 4
                        + b3p.size * 4 + B_pad * 4),
    )

    out = pl.pallas_call(
        _mse_mlp_kernel,
        out_shape=jax.ShapeDtypeStruct((B_pad, 1), jnp.float32),
        grid_spec=pltpu.PrefetchScalarGridSpec(
            num_scalar_prefetch=0,
            grid=(nb,),
            in_specs=[
                pl.BlockSpec((tm, in_dim), lambda i: (i, 0)),      # x tile (pipelined)
                pl.BlockSpec((in_dim, H_pad), lambda i: (0, 0)),   # w1 (VMEM-resident)
                pl.BlockSpec((1, H_pad), lambda i: (0, 0)),        # b1
                pl.BlockSpec((H_pad, H_pad), lambda i: (0, 0)),    # w2 (VMEM-resident)
                pl.BlockSpec((1, H_pad), lambda i: (0, 0)),        # b2
                pl.BlockSpec((1, H_pad), lambda i: (0, 0)),        # w3 as row
                pl.BlockSpec((1, 1), lambda i: (0, 0)),            # b3
            ],
            out_specs=pl.BlockSpec((tm, 1), lambda i: (i, 0)),
        ),
        compiler_params=pltpu.CompilerParams(
            dimension_semantics=("parallel",),
        ),
        cost_estimate=cost,
    )(x_bf, w1_bf, b1p, w2_bf, b2p, w3_bf, b3p)

    # nn.Linear(..., 1) output has shape (B, 1); forward() does .squeeze()
    return jnp.squeeze(out[:B])


def init_params(key, in_dim, hidden_dim=64):
    """Deterministic init matching nn.Linear default: U(-1/sqrt(fan_in), 1/sqrt(fan_in))."""
    ks = jax.random.split(key, 6)

    def linear(kw, kb, fan_in, fan_out):
        bound = 1.0 / jnp.sqrt(fan_in)
        w = jax.random.uniform(kw, (fan_in, fan_out), jnp.float32, -bound, bound)
        b = jax.random.uniform(kb, (1, fan_out), jnp.float32, -bound, bound)
        return w, b

    w1, b1 = linear(ks[0], ks[1], in_dim, hidden_dim)
    w2, b2 = linear(ks[2], ks[3], hidden_dim, hidden_dim)
    w3, b3 = linear(ks[4], ks[5], hidden_dim, 1)
    return (w1, b1, w2, b2, w3, b3)


def _reference_forward_bf16(x, params):
    """Reference matching the kernel's numerics: bf16 matmul operands, f32 accumulate."""
    w1, b1, w2, b2, w3, b3 = params
    up = lambda a: a.astype(jnp.bfloat16).astype(jnp.float32)
    h1 = jnp.maximum(up(x) @ up(w1) + b1, 0.0)
    h2 = jnp.maximum(up(h1) @ up(w2) + b2, 0.0)
    return jnp.squeeze(h2 @ up(w3) + b3)


if __name__ == "__main__":
    key = jax.random.PRNGKey(0)
    k_x, k_p = jax.random.split(key)

    B, in_dim, hidden_dim = 8, 16, 64
    x = jax.random.normal(k_x, (B, in_dim), dtype=jnp.float32)
    params = init_params(k_p, in_dim, hidden_dim)

    fwd = jax.jit(lambda xx: mse_model_forward(xx, params))
    y = jax.block_until_ready(fwd(x))

    y_ref = _reference_forward_bf16(x, params)
    assert y.shape == (B,), f"expected shape {(B,)}, got {y.shape}"
    assert jnp.allclose(y, y_ref, atol=1e-3, rtol=1e-3), "mismatch vs reference"

    print("KERNEL_OK")
</pallas_src>

<mosaic_0001>
module attributes {stable_mosaic.version = 11 : i64} {
  func.func @_mse_mlp_kernel(%arg0: i32, %arg1: memref<16x16xbf16, #tpu.memory_space<vmem>>, %arg2: memref<16x128xbf16, #tpu.memory_space<vmem>>, %arg3: memref<1x128xf32, #tpu.memory_space<vmem>>, %arg4: memref<128x128xbf16, #tpu.memory_space<vmem>>, %arg5: memref<1x128xf32, #tpu.memory_space<vmem>>, %arg6: memref<1x128xbf16, #tpu.memory_space<vmem>>, %arg7: memref<1x1xf32, #tpu.memory_space<vmem>>, %arg8: memref<16x1xf32, #tpu.memory_space<vmem>>) attributes {dimension_semantics = [#tpu.dimension_semantics<parallel>], iteration_bounds = array<i64: 1>, scalar_prefetch = 0 : i64, scratch_operands = 0 : i64, tpu.core_type = #tpu.core_type<tc>, window_params = [{transform_indices = @transform_0, window_bounds = array<i64: 16, 16>}, {pipeline_mode = #tpu.pipeline_mode<synchronous>, transform_indices = @transform_1, window_bounds = array<i64: 16, 128>}, {pipeline_mode = #tpu.pipeline_mode<synchronous>, transform_indices = @transform_2, window_bounds = array<i64: 1, 128>}, {pipeline_mode = #tpu.pipeline_mode<synchronous>, transform_indices = @transform_3, window_bounds = array<i64: 128, 128>}, {pipeline_mode = #tpu.pipeline_mode<synchronous>, transform_indices = @transform_4, window_bounds = array<i64: 1, 128>}, {pipeline_mode = #tpu.pipeline_mode<synchronous>, transform_indices = @transform_5, window_bounds = array<i64: 1, 128>}, {pipeline_mode = #tpu.pipeline_mode<synchronous>, transform_indices = @transform_6, window_bounds = array<i64: 1, 1>}, {transform_indices = @transform_7, window_bounds = array<i64: 16, 1>}]} {
    %c0 = arith.constant 0 : index
    %c0_0 = arith.constant 0 : index
    %0 = vector.load %arg1[%c0, %c0_0] : memref<16x16xbf16, #tpu.memory_space<vmem>>, vector<16x16xbf16>
    %c0_1 = arith.constant 0 : index
    %c0_2 = arith.constant 0 : index
    %1 = vector.load %arg2[%c0_1, %c0_2] : memref<16x128xbf16, #tpu.memory_space<vmem>>, vector<16x128xbf16>
    %cst = arith.constant dense<0.000000e+00> : vector<16x128xf32>
    %2 = tpu.matmul %0, %1, %cst {dimension_numbers = #tpu.dot_dimension_numbers<[1], [0], [0], [1], [0, 0, 1, 1], [], []>} : vector<16x16xbf16>, vector<16x128xbf16>, vector<16x128xf32> -> vector<16x128xf32>
    %c0_3 = arith.constant 0 : index
    %c0_4 = arith.constant 0 : index
    %3 = vector.load %arg3[%c0_3, %c0_4] : memref<1x128xf32, #tpu.memory_space<vmem>>, vector<1x128xf32>
    %4 = vector.broadcast %3 : vector<1x128xf32> to vector<16x128xf32>
    %5 = arith.addf %2, %4 : vector<16x128xf32>
    %cst_5 = arith.constant 0.000000e+00 : f32
    %6 = vector.broadcast %cst_5 : f32 to vector<16x128xf32>
    %7 = arith.maximumf %5, %6 : vector<16x128xf32>
    %8 = arith.truncf %7 : vector<16x128xf32> to vector<16x128xbf16>
    %c0_6 = arith.constant 0 : index
    %c0_7 = arith.constant 0 : index
    %9 = vector.load %arg4[%c0_6, %c0_7] : memref<128x128xbf16, #tpu.memory_space<vmem>>, vector<128x128xbf16>
    %cst_8 = arith.constant dense<0.000000e+00> : vector<16x128xf32>
    %10 = tpu.matmul %8, %9, %cst_8 {dimension_numbers = #tpu.dot_dimension_numbers<[1], [0], [0], [1], [0, 0, 1, 1], [], []>} : vector<16x128xbf16>, vector<128x128xbf16>, vector<16x128xf32> -> vector<16x128xf32>
    %c0_9 = arith.constant 0 : index
    %c0_10 = arith.constant 0 : index
    %11 = vector.load %arg5[%c0_9, %c0_10] : memref<1x128xf32, #tpu.memory_space<vmem>>, vector<1x128xf32>
    %12 = vector.broadcast %11 : vector<1x128xf32> to vector<16x128xf32>
    %13 = arith.addf %10, %12 : vector<16x128xf32>
    %cst_11 = arith.constant 0.000000e+00 : f32
    %14 = vector.broadcast %cst_11 : f32 to vector<16x128xf32>
    %15 = arith.maximumf %13, %14 : vector<16x128xf32>
    %c0_12 = arith.constant 0 : index
    %c0_13 = arith.constant 0 : index
    %16 = vector.load %arg6[%c0_12, %c0_13] : memref<1x128xbf16, #tpu.memory_space<vmem>>, vector<1x128xbf16>
    %17 = arith.extf %16 : vector<1x128xbf16> to vector<1x128xf32>
    %18 = vector.broadcast %17 : vector<1x128xf32> to vector<16x128xf32>
    %19 = arith.mulf %15, %18 : vector<16x128xf32>
    %cst_14 = arith.constant dense<0.000000e+00> : vector<16xf32>
    %20 = vector.multi_reduction <add>, %19, %cst_14 [1] : vector<16x128xf32> to vector<16xf32>
    %21 = vector.shape_cast %20 : vector<16xf32> to vector<16x1xf32>
    %c0_15 = arith.constant 0 : index
    %c0_16 = arith.constant 0 : index
    %22 = vector.load %arg7[%c0_15, %c0_16] : memref<1x1xf32, #tpu.memory_space<vmem>>, vector<1x1xf32>
    %23 = vector.broadcast %22 : vector<1x1xf32> to vector<16x1xf32>
    %24 = arith.addf %21, %23 : vector<16x1xf32>
    %c0_17 = arith.constant 0 : index
    %c0_18 = arith.constant 0 : index
    %25 = vector.load %arg8[%c0_17, %c0_18] : memref<16x1xf32, #tpu.memory_space<vmem>>, vector<16x1xf32>
    tpu.vector_store %arg8[%c0_17, %c0_18], %24 {strides = array<i32>} : memref<16x1xf32, #tpu.memory_space<vmem>>, vector<16x1xf32>,
    return
  }
  func.func @transform_0(%arg0: i32) -> (i32, i32) {
    %c0_i32 = arith.constant 0 : i32
    %c0_i32_0 = arith.constant 0 : i32
    return %arg0, %c0_i32 : i32, i32
  }
  func.func @transform_1(%arg0: i32) -> (i32, i32) {
    %c0_i32 = arith.constant 0 : i32
    %c0_i32_0 = arith.constant 0 : i32
    %c0_i32_1 = arith.constant 0 : i32
    return %c0_i32, %c0_i32_0 : i32, i32
  }
  func.func @transform_2(%arg0: i32) -> (i32, i32) {
    %c0_i32 = arith.constant 0 : i32
    %c0_i32_0 = arith.constant 0 : i32
    %c0_i32_1 = arith.constant 0 : i32
    return %c0_i32, %c0_i32_0 : i32, i32
  }
  func.func @transform_3(%arg0: i32) -> (i32, i32) {
    %c0_i32 = arith.constant 0 : i32
    %c0_i32_0 = arith.constant 0 : i32
    %c0_i32_1 = arith.constant 0 : i32
    return %c0_i32, %c0_i32_0 : i32, i32
  }
  func.func @transform_4(%arg0: i32) -> (i32, i32) {
    %c0_i32 = arith.constant 0 : i32
    %c0_i32_0 = arith.constant 0 : i32
    %c0_i32_1 = arith.constant 0 : i32
    return %c0_i32, %c0_i32_0 : i32, i32
  }
  func.func @transform_5(%arg0: i32) -> (i32, i32) {
    %c0_i32 = arith.constant 0 : i32
    %c0_i32_0 = arith.constant 0 : i32
    %c0_i32_1 = arith.constant 0 : i32
    return %c0_i32, %c0_i32_0 : i32, i32
  }
  func.func @transform_6(%arg0: i32) -> (i32, i32) {
    %c0_i32 = arith.constant 0 : i32
    %c0_i32_0 = arith.constant 0 : i32
    %c0_i32_1 = arith.constant 0 : i32
    return %c0_i32, %c0_i32_0 : i32, i32
  }
  func.func @transform_7(%arg0: i32) -> (i32, i32) {
    %c0_i32 = arith.constant 0 : i32
    %c0_i32_0 = arith.constant 0 : i32
    return %arg0, %c0_i32 : i32, i32
  }
}

</mosaic_0001>

<bundles_post_ra>
// kernel: _lambda_.1
= control target key start
LH: loop header
LB: loop body
LE: loop exit
PB: predicated region body
PF: predicated region fallthrough
CT: control target
= control target key end

     0   :  { %s345_s0 = inlined_call_operand.vmem [shape: bf16[16,16], index: 0, kind: input, shape index: {}]   ;;  %s346_s1 = inlined_call_operand.vmem [shape: bf16[16,128], index: 1, kind: input, shape index: {}]   ;;  %s347_s2 = inlined_call_operand.vmem [shape: f32[1,128], index: 2, kind: input, shape index: {}]   ;;  %s348_s3 = inlined_call_operand.hbm [shape: bf16[128,128], index: 3, kind: input, shape index: {}]   ;;  %s349_s4 = inlined_call_operand.vmem [shape: f32[1,128], index: 4, kind: input, shape index: {}]   ;;  %s350_s5 = inlined_call_operand.vmem [shape: bf16[1,128], index: 5, kind: input, shape index: {}]   ;;  %s351_s6 = inlined_call_operand.<no memory space> [shape: f32[1,1], index: 6, kind: input, shape index: {}]   ;;  %s352_s7 = inlined_call_operand.vmem [shape: f32[16,1], index: 7, kind: output, shape index: {}]  }
   0x1   :  { %v12_v0 = vstv %s351_s6 }
   0x2   :  { %13 = vst [vmem:[#allocation2] sm:$0x1] %v12_v0 }
   0x3   :  { %14 = vsyncpa [#allocation4], 0  ;;  %s25_s28 = sshll.u32 %s348_s3, 4  ;;  %s275_s29 = smov [#allocation3]   ;;  %s26_s28 = int_to_ptr.hbm [resolvable:$true] %s25_s28 }
   0x4   :  { %s27_s30 = sshll.u32 %s275_s29, 4  ;;  %s276_s8 = smov 64   ;;  %s28_s30 = int_to_ptr.vmem [resolvable:$true] %s27_s30 }
   0x5   :  { %s277_s9 = smov 4  }
   0x6   :  { %33 = dma.hbm_to_vmem [thread:$0]  %s26_s28, 1024, %s28_s30, [#allocation4], %s276_s8, %s276_s8, %s277_s9  }
   0x7   :  { %273 = dma.done.wait [#allocation4], 1024  }
   0x8   :  { %274 = vsyncadd [#allocation4], 4294966272  ;;  %v234_v1 = vld [vmem:[%s346_s1] sm:$0xff]  ;;  %vm64_vm0 = vcmask 130048   ;;  %v241_v4 = vld [vmem:[#allocation3 + $0x30] sm:$0xff]  ;;  %vm184_vm1 = vcmask 7168  }
   0x9   :  { %v242_v2 = vld [vmem:[#allocation3 + $0x38] sm:$0xff]  ;;  %75 = vmatpush.bf16.msra.mxu0 %v234_v1  ;;  %v240_v5 = vld [vmem:[#allocation3 + $0x28] sm:$0xff]  ;;  %v239_v6 = vld [vmem:[#allocation3 + $0x20] sm:$0xff] }
   0xa   :  { %v233_v3 = vld [vmem:[%s345_s0] sm:$0xff]  ;;  %153 = vmatpush.bf16.msra.mxu1 %v242_v2  ;;  %v237_v8 = vld [vmem:[#allocation3 + $0x10] sm:$0xff]  ;;  %v236_v9 = vld [vmem:[#allocation3 + $0x8] sm:$0xff] }
   0xb   :  { %v238_v7 = vld [vmem:[#allocation3 + $0x18] sm:$0xff]  ;;  %v235_v10 = vld [vmem:[#allocation3] sm:$0xff] }
   0xc   :  { %200 = vmatmul.msk.bf16.vlgmr.msra.gmra.mxu0 %vm64_vm0, %v233_v3  ;;  %v246_v12 = vld [vmem:[%s347_s2] ss:$0 sm:$0xff] }
   0xd   :  { %v169_v19 = vld [vmem:[%s350_s5] sm:$0x1] }
   0xe   :  { %154 = vmatpush.bf16.msra.mxu1 %v241_v4  ;;  %v247_v20 = vld [vmem:[%s349_s4] ss:$0 sm:$0xff]  ;;  %v170_v21 = vunpack.c.l.bf16 %v169_v19 }
   0xf   :  { %v248_v31 = vld [vmem:[#allocation2] ss:$0 sm:$0xff] }
  0x10   :  { %v171_v24 = vperm.slane %v170_v21, 0 }
  0x12   :  { %155 = vmatpush.bf16.msra.mxu1 %v240_v5 }
  0x16   :  { %156 = vmatpush.bf16.msra.mxu1 %v239_v6 }
  0x1a   :  { %157 = vmatpush.bf16.msra.mxu1 %v238_v7 }
  0x1e   :  { %158 = vmatpush.bf16.msra.mxu1 %v237_v8 }
  0x22   :  { %159 = vmatpush.bf16.msra.mxu1 %v236_v9 }
  0x26   :  { %160 = vmatpush.bf16.msra.mxu1 %v235_v10 }
  0x89   :  { %v77_v11 = vpop.f32.mrf.mxu0 }
  0x8a   :  { %v78_v13 = vadd.f32 %v246_v12, %v77_v11 }
  0x8c   :  { %v82_v16 = vmax.f32 %v78_v13, 0.0 }
  0x91   :  { %v79_v14 = vpop.f32.mrf.mxu0 }
  0x92   :  { %v80_v15 = vadd.f32 %v246_v12, %v79_v14 }
  0x94   :  { %v83_v17 = vmax.f32 %v80_v15, 0.0 }
  0x96   :  { %v84_v18 = vpack.c.bf16 %v83_v17, %v82_v16 }
  0x98   :  { %161 = vmatmul.bf16.vlgmr.msra.gmra.mxu1 %v84_v18 }
 0x115   :  { %v162_v22 = vpop.f32.mrf.mxu1 }
 0x116   :  { %v163_v23 = vadd.f32 %v247_v20, %v162_v22 }
 0x118   :  { %v167_v25 = vmax.f32 %v163_v23, 0.0 }
 0x11a   :  { %v172_v26 = vmul.f32 %v171_v24, %v167_v25 }
 0x11c   :  { %174 = vadd.xlane.f32.xlu0 %v172_v26 }
 0x11d   :  { %v164_v27 = vpop.f32.mrf.mxu1 }
 0x11e   :  { %v165_v28 = vadd.f32 %v247_v20, %v164_v27 }
 0x120   :  { %v168_v29 = vmax.f32 %v165_v28, 0.0 }
 0x122   :  { %v173_v30 = vmul.f32 %v171_v24, %v168_v29 }
 0x124   :  { %176 = vadd.xlane.f32.xlu0 %v173_v30 }
 0x18f   :  { %v175_v32 = vpop.xlane.xlu0 %174 }
 0x190   :  { %v182_v33 = vadd.f32 %v248_v31, %v175_v32 }
 0x192   :  { %185 = vst.msk [vmem:[%s352_s7] sm:$0xff] %vm184_vm1, %v182_v33 }
 0x197   :  { %v177_v34 = vpop.xlane.xlu0 %176 }
 0x198   :  { %v183_v35 = vadd.f32 %v248_v31, %v177_v34 }
 0x19a   :  { %186 = vst.msk [vmem:[%s352_s7 + $0x8] sm:$0xff] %vm184_vm1, %v183_v35 }
 0x19b   :  { %191 = vsyncpa [#allocation4], 1 }

</bundles_post_ra>
